<compile_context>
chip_gen: v5e
topology: v5e:2x2
jax: 0.10.0
libtpu: 0.0.40
codegen_flags: <defaults>
</compile_context>

<pallas_src>
import jax
import jax.numpy as jnp
from jax.experimental import pallas as pl
from jax.experimental.pallas import tpu as pltpu

LANE = 128
SUBLANE_PACK = 16  # bf16 sublane packing; also a multiple of the f32 sublane (8)


def _round_up(x, m):
    return (x + m - 1) // m * m


def _mlp_kernel(x_ref, w1_ref, b1_ref, w2_ref, b2_ref, w3_ref, b3_ref, o_ref):
    # MXU operands in the weights' dtype (bf16 recommended on all gens);
    # f32 accumulation; bias / ReLU / log-softmax stay in f32 on the VPU/EUP.
    x = x_ref[...].astype(w1_ref.dtype)

    # fc1 + ReLU
    h1 = jnp.dot(x, w1_ref[...], preferred_element_type=jnp.float32) + b1_ref[...]
    h1 = jnp.maximum(h1, 0.0).astype(w2_ref.dtype)

    # fc2 + ReLU
    h2 = jnp.dot(h1, w2_ref[...], preferred_element_type=jnp.float32) + b2_ref[...]
    h2 = jnp.maximum(h2, 0.0).astype(w3_ref.dtype)

    # fc3: class-padding mask is baked into b3 (-1e30 on padded lanes, zero w3
    # columns), so padded logits are -1e30 and vanish in the softmax -- no
    # iota / where needed in the hot path.
    logits = jnp.dot(h2, w3_ref[...], preferred_element_type=jnp.float32) + b3_ref[...]

    # LogSoftmax along dim=1 (classes), max-shifted for stability.
    m = jnp.max(logits, axis=-1, keepdims=True)
    shifted = logits - m
    lse = jnp.log(jnp.sum(jnp.exp(shifted), axis=-1, keepdims=True))
    o_ref[...] = (shifted - lse).astype(o_ref.dtype)


def prepare_params(w1, b1, w2, b2, w3, b3, *, weight_dtype=jnp.float32):
    """One-time parameter prep (not in the hot path).

    Torch-layout weights [out, in] -> [in, out], every layer's output dim is
    zero-padded to a multiple of 128 lanes (next layer's input dim padded to
    match), weights cast to `weight_dtype` (bf16 is fine on v5e/v6e/v7x).
    Biases stay f32 as [1, out_padded]; the fc3 padded class lanes get -1e30
    so no masking is needed in-kernel.
    """
    def prep(w, b, in_pad, out_pad, pad_bias_value=0.0):
        out_f, in_f = w.shape
        wt = jnp.zeros((in_pad, out_pad), weight_dtype)
        wt = wt.at[:in_f, :out_f].set(w.T.astype(weight_dtype))
        br = jnp.full((1, out_pad), jnp.float32(pad_bias_value), jnp.float32)
        br = br.at[0, :out_f].set(b.astype(jnp.float32))
        return wt, br

    in_size = w1.shape[1]
    h1, h2, nc = w1.shape[0], w2.shape[0], w3.shape[0]
    h1p, h2p, ncp = _round_up(h1, LANE), _round_up(h2, LANE), _round_up(nc, LANE)

    w1t, b1r = prep(w1, b1, in_size, h1p)
    w2t, b2r = prep(w2, b2, h1p, h2p)
    w3t, b3r = prep(w3, b3, h2p, ncp, pad_bias_value=-1e30)
    return dict(w1=w1t, b1=b1r, w2=w2t, b2=b2r, w3=w3t, b3=b3r,
                num_classes=nc, num_classes_padded=ncp)


def mlp_forward(x, params, *, block_b=512, out_dtype=jnp.float32):
    """x: [B, input_size] float; params from prepare_params().

    Returns [B, num_classes] in `out_dtype` (bf16 halves the dominant HBM
    writeback stream if downstream tolerates it).
    """
    B, k = x.shape
    nc = params["num_classes"]
    ncp = params["num_classes_padded"]

    # Batch tile: multiple of 16 sublanes, capped at block_b (default 512);
    # pad B up to a multiple of the tile.
    tb = min(block_b, _round_up(B, SUBLANE_PACK))
    bp = _round_up(B, tb)
    if bp != B:
        x = jnp.pad(x, ((0, bp - B), (0, 0)))

    w1, b1 = params["w1"], params["b1"]
    w2, b2 = params["w2"], params["b2"]
    w3, b3 = params["w3"], params["b3"]

    def resident(arr):
        # Whole array VMEM-resident across the batch grid. Constant index_map
        # => never re-DMA'd, so single-buffer it to halve resident footprint.
        return pl.BlockSpec(arr.shape, lambda i: (0,) * arr.ndim,
                            memory_space=pltpu.VMEM,
                            pipeline_mode=pl.Buffered(1))

    out_itemsize = jnp.dtype(out_dtype).itemsize
    resident_bytes = sum(a.size * a.dtype.itemsize
                         for a in (w1, b1, w2, b2, w3, b3))
    # x / out batch tiles are double-buffered by the pipeline.
    tile_bytes = 2 * tb * (k * x.dtype.itemsize + ncp * out_itemsize)
    # Explicit scoped-VMEM sizing so larger batch tiles aren't rejected by the
    # 16/32 MiB defaults; capped at v7x's 64 MiB physical VMEM.
    vmem_limit = int(min(max(resident_bytes + tile_bytes + (4 << 20), 16 << 20),
                         64 << 20))

    flops = 2 * bp * (w1.shape[0] * w1.shape[1]
                      + w2.shape[0] * w2.shape[1]
                      + w3.shape[0] * w3.shape[1])
    bytes_accessed = (x.size * x.dtype.itemsize + resident_bytes
                      + bp * ncp * out_itemsize)

    out = pl.pallas_call(
        _mlp_kernel,
        out_shape=jax.ShapeDtypeStruct((bp, ncp), out_dtype),
        grid=(bp // tb,),
        in_specs=[
            # x tile: default double-buffering; bump to pl.Buffered(3) only if
            # profiling shows exposed input DMA after enlarging the tile.
            pl.BlockSpec((tb, k), lambda i: (i, 0), memory_space=pltpu.VMEM),
            resident(w1), resident(b1),
            resident(w2), resident(b2),
            resident(w3), resident(b3),
        ],
        out_specs=pl.BlockSpec((tb, ncp), lambda i: (i, 0),
                               memory_space=pltpu.VMEM),
        compiler_params=pltpu.CompilerParams(
            dimension_semantics=("parallel",),
            vmem_limit_bytes=vmem_limit),
        cost_estimate=pl.CostEstimate(flops=flops,
                                      transcendentals=bp * (ncp + 1),
                                      bytes_accessed=bytes_accessed),
    )(x, w1, b1, w2, b2, w3, b3)

    return out[:B, :nc]


def _init_linear(key, out_features, in_features):
    # Deterministic init mimicking torch's default bound 1/sqrt(fan_in).
    kw, kb = jax.random.split(key)
    bound = 1.0 / jnp.sqrt(jnp.float32(in_features))
    w = jax.random.uniform(kw, (out_features, in_features), jnp.float32, -bound, bound)
    b = jax.random.uniform(kb, (out_features,), jnp.float32, -bound, bound)
    return w, b


def _reference(x, w1, b1, w2, b2, w3, b3):
    h1 = jnp.maximum(x @ w1.T + b1, 0.0)
    h2 = jnp.maximum(h1 @ w2.T + b2, 0.0)
    logits = h2 @ w3.T + b3
    return jax.nn.log_softmax(logits, axis=1)


if __name__ == "__main__":
    # Iris-like sizes: 4 input features, two hidden layers, 21 classes (module default).
    input_size, hidden1, hidden2, num_classes = 4, 32, 16, 21
    batch = 8

    key = jax.random.PRNGKey(0)
    kx, kx2, k1, k2, k3 = jax.random.split(key, 5)

    x = jax.random.normal(kx, (batch, input_size), jnp.float32)
    w1, b1 = _init_linear(k1, hidden1, input_size)
    w2, b2 = _init_linear(k2, hidden2, hidden1)
    w3, b3 = _init_linear(k3, num_classes, hidden2)

    ref = _reference(x, w1, b1, w2, b2, w3, b3)

    # fp32 weights, fp32 output: tight check.
    params_f32 = prepare_params(w1, b1, w2, b2, w3, b3, weight_dtype=jnp.float32)
    out = jax.block_until_ready(mlp_forward(x, params_f32))
    assert out.shape == (batch, num_classes)
    assert jnp.allclose(out, ref, atol=1e-5), "fp32 mismatch vs reference"

    # bf16 MXU operands (fine on v5e/v6e/v7x), f32 accumulation; looser check.
    params_bf16 = prepare_params(w1, b1, w2, b2, w3, b3, weight_dtype=jnp.bfloat16)
    out_bf16w = jax.block_until_ready(mlp_forward(x, params_bf16))
    assert out_bf16w.shape == (batch, num_classes)
    assert jnp.allclose(out_bf16w, ref, atol=1e-1, rtol=1e-1), "bf16-weight mismatch"

    # bf16 output (halves the dominant writeback stream); looser check.
    out_bf16o = jax.block_until_ready(
        mlp_forward(x, params_f32, out_dtype=jnp.bfloat16))
    assert out_bf16o.shape == (batch, num_classes)
    assert out_bf16o.dtype == jnp.bfloat16
    assert jnp.allclose(out_bf16o.astype(jnp.float32), ref, atol=2e-1, rtol=5e-2), \
        "bf16-output mismatch"

    # Larger batch exercising multiple grid tiles + batch padding with the new
    # default block_b=512 (1200 -> padded 1536, grid=(3,)).
    big_batch = 1200
    xb = jax.random.normal(kx2, (big_batch, input_size), jnp.float32)
    out_big = jax.block_until_ready(mlp_forward(xb, params_f32))
    ref_big = _reference(xb, w1, b1, w2, b2, w3, b3)
    assert out_big.shape == (big_batch, num_classes)
    assert jnp.allclose(out_big, ref_big, atol=1e-5), "batched mismatch vs reference"

    print("KERNEL_OK")
</pallas_src>

<mosaic_0001>
module attributes {stable_mosaic.version = 11 : i64} {
  func.func @_mlp_kernel(%arg0: i32, %arg1: memref<16x4xf32, #tpu.memory_space<vmem>>, %arg2: memref<4x128xf32, #tpu.memory_space<vmem>>, %arg3: memref<1x128xf32, #tpu.memory_space<vmem>>, %arg4: memref<128x128xf32, #tpu.memory_space<vmem>>, %arg5: memref<1x128xf32, #tpu.memory_space<vmem>>, %arg6: memref<128x128xf32, #tpu.memory_space<vmem>>, %arg7: memref<1x128xf32, #tpu.memory_space<vmem>>, %arg8: memref<16x128xf32, #tpu.memory_space<vmem>>) attributes {dimension_semantics = [#tpu.dimension_semantics<parallel>], iteration_bounds = array<i64: 1>, scalar_prefetch = 0 : i64, scratch_operands = 0 : i64, tpu.core_type = #tpu.core_type<tc>, window_params = [{transform_indices = @transform_0, window_bounds = array<i64: 16, 4>}, {pipeline_mode = #tpu.pipeline_mode<synchronous>, transform_indices = @transform_1, window_bounds = array<i64: 4, 128>}, {pipeline_mode = #tpu.pipeline_mode<synchronous>, transform_indices = @transform_2, window_bounds = array<i64: 1, 128>}, {pipeline_mode = #tpu.pipeline_mode<synchronous>, transform_indices = @transform_3, window_bounds = array<i64: 128, 128>}, {pipeline_mode = #tpu.pipeline_mode<synchronous>, transform_indices = @transform_4, window_bounds = array<i64: 1, 128>}, {pipeline_mode = #tpu.pipeline_mode<synchronous>, transform_indices = @transform_5, window_bounds = array<i64: 128, 128>}, {pipeline_mode = #tpu.pipeline_mode<synchronous>, transform_indices = @transform_6, window_bounds = array<i64: 1, 128>}, {transform_indices = @transform_7, window_bounds = array<i64: 16, 128>}]} {
    %c0 = arith.constant 0 : index
    %c0_0 = arith.constant 0 : index
    %0 = vector.load %arg1[%c0, %c0_0] : memref<16x4xf32, #tpu.memory_space<vmem>>, vector<16x4xf32>
    %c0_1 = arith.constant 0 : index
    %c0_2 = arith.constant 0 : index
    %1 = vector.load %arg2[%c0_1, %c0_2] : memref<4x128xf32, #tpu.memory_space<vmem>>, vector<4x128xf32>
    %cst = arith.constant dense<0.000000e+00> : vector<16x128xf32>
    %2 = tpu.matmul %0, %1, %cst {dimension_numbers = #tpu.dot_dimension_numbers<[1], [0], [0], [1], [0, 0, 1, 1], [], []>} : vector<16x4xf32>, vector<4x128xf32>, vector<16x128xf32> -> vector<16x128xf32>
    %c0_3 = arith.constant 0 : index
    %c0_4 = arith.constant 0 : index
    %3 = vector.load %arg3[%c0_3, %c0_4] : memref<1x128xf32, #tpu.memory_space<vmem>>, vector<1x128xf32>
    %4 = vector.broadcast %3 : vector<1x128xf32> to vector<16x128xf32>
    %5 = arith.addf %2, %4 : vector<16x128xf32>
    %cst_5 = arith.constant 0.000000e+00 : f32
    %6 = vector.broadcast %cst_5 : f32 to vector<16x128xf32>
    %7 = arith.maximumf %5, %6 : vector<16x128xf32>
    %c0_6 = arith.constant 0 : index
    %c0_7 = arith.constant 0 : index
    %8 = vector.load %arg4[%c0_6, %c0_7] : memref<128x128xf32, #tpu.memory_space<vmem>>, vector<128x128xf32>
    %cst_8 = arith.constant dense<0.000000e+00> : vector<16x128xf32>
    %9 = tpu.matmul %7, %8, %cst_8 {dimension_numbers = #tpu.dot_dimension_numbers<[1], [0], [0], [1], [0, 0, 1, 1], [], []>} : vector<16x128xf32>, vector<128x128xf32>, vector<16x128xf32> -> vector<16x128xf32>
    %c0_9 = arith.constant 0 : index
    %c0_10 = arith.constant 0 : index
    %10 = vector.load %arg5[%c0_9, %c0_10] : memref<1x128xf32, #tpu.memory_space<vmem>>, vector<1x128xf32>
    %11 = vector.broadcast %10 : vector<1x128xf32> to vector<16x128xf32>
    %12 = arith.addf %9, %11 : vector<16x128xf32>
    %cst_11 = arith.constant 0.000000e+00 : f32
    %13 = vector.broadcast %cst_11 : f32 to vector<16x128xf32>
    %14 = arith.maximumf %12, %13 : vector<16x128xf32>
    %c0_12 = arith.constant 0 : index
    %c0_13 = arith.constant 0 : index
    %15 = vector.load %arg6[%c0_12, %c0_13] : memref<128x128xf32, #tpu.memory_space<vmem>>, vector<128x128xf32>
    %cst_14 = arith.constant dense<0.000000e+00> : vector<16x128xf32>
    %16 = tpu.matmul %14, %15, %cst_14 {dimension_numbers = #tpu.dot_dimension_numbers<[1], [0], [0], [1], [0, 0, 1, 1], [], []>} : vector<16x128xf32>, vector<128x128xf32>, vector<16x128xf32> -> vector<16x128xf32>
    %c0_15 = arith.constant 0 : index
    %c0_16 = arith.constant 0 : index
    %17 = vector.load %arg7[%c0_15, %c0_16] : memref<1x128xf32, #tpu.memory_space<vmem>>, vector<1x128xf32>
    %18 = vector.broadcast %17 : vector<1x128xf32> to vector<16x128xf32>
    %19 = arith.addf %16, %18 : vector<16x128xf32>
    %cst_17 = arith.constant dense<0xFF800000> : vector<16xf32>
    %20 = vector.multi_reduction <maximumf>, %19, %cst_17 [1] : vector<16x128xf32> to vector<16xf32>
    %21 = vector.shape_cast %20 : vector<16xf32> to vector<16x1xf32>
    %22 = vector.broadcast %21 : vector<16x1xf32> to vector<16x128xf32>
    %23 = arith.subf %19, %22 : vector<16x128xf32>
    %24 = math.exp %23 : vector<16x128xf32>
    %cst_18 = arith.constant dense<0.000000e+00> : vector<16xf32>
    %25 = vector.multi_reduction <add>, %24, %cst_18 [1] : vector<16x128xf32> to vector<16xf32>
    %26 = vector.shape_cast %25 : vector<16xf32> to vector<16x1xf32>
    %27 = math.log %26 : vector<16x1xf32>
    %28 = vector.broadcast %27 : vector<16x1xf32> to vector<16x128xf32>
    %29 = arith.subf %23, %28 : vector<16x128xf32>
    %c0_19 = arith.constant 0 : index
    %c0_20 = arith.constant 0 : index
    %30 = vector.load %arg8[%c0_19, %c0_20] : memref<16x128xf32, #tpu.memory_space<vmem>>, vector<16x128xf32>
    tpu.vector_store %arg8[%c0_19, %c0_20], %29 {strides = array<i32>} : memref<16x128xf32, #tpu.memory_space<vmem>>, vector<16x128xf32>,
    return
  }
  func.func @transform_0(%arg0: i32) -> (i32, i32) {
    %c0_i32 = arith.constant 0 : i32
    %c0_i32_0 = arith.constant 0 : i32
    return %arg0, %c0_i32 : i32, i32
  }
  func.func @transform_1(%arg0: i32) -> (i32, i32) {
    %c0_i32 = arith.constant 0 : i32
    %c0_i32_0 = arith.constant 0 : i32
    %c0_i32_1 = arith.constant 0 : i32
    return %c0_i32, %c0_i32_0 : i32, i32
  }
  func.func @transform_2(%arg0: i32) -> (i32, i32) {
    %c0_i32 = arith.constant 0 : i32
    %c0_i32_0 = arith.constant 0 : i32
    %c0_i32_1 = arith.constant 0 : i32
    return %c0_i32, %c0_i32_0 : i32, i32
  }
  func.func @transform_3(%arg0: i32) -> (i32, i32) {
    %c0_i32 = arith.constant 0 : i32
    %c0_i32_0 = arith.constant 0 : i32
    %c0_i32_1 = arith.constant 0 : i32
    return %c0_i32, %c0_i32_0 : i32, i32
  }
  func.func @transform_4(%arg0: i32) -> (i32, i32) {
    %c0_i32 = arith.constant 0 : i32
    %c0_i32_0 = arith.constant 0 : i32
    %c0_i32_1 = arith.constant 0 : i32
    return %c0_i32, %c0_i32_0 : i32, i32
  }
  func.func @transform_5(%arg0: i32) -> (i32, i32) {
    %c0_i32 = arith.constant 0 : i32
    %c0_i32_0 = arith.constant 0 : i32
    %c0_i32_1 = arith.constant 0 : i32
    return %c0_i32, %c0_i32_0 : i32, i32
  }
  func.func @transform_6(%arg0: i32) -> (i32, i32) {
    %c0_i32 = arith.constant 0 : i32
    %c0_i32_0 = arith.constant 0 : i32
    %c0_i32_1 = arith.constant 0 : i32
    return %c0_i32, %c0_i32_0 : i32, i32
  }
  func.func @transform_7(%arg0: i32) -> (i32, i32) {
    %c0_i32 = arith.constant 0 : i32
    %c0_i32_0 = arith.constant 0 : i32
    return %arg0, %c0_i32 : i32, i32
  }
}

</mosaic_0001>

<bundles_post_ra>
// kernel: tpu_custom_call.1
= control target key start
LH: loop header
LB: loop body
LE: loop exit
PB: predicated region body
PF: predicated region fallthrough
CT: control target
= control target key end

     0   :  { %12 = vsyncpa [#allocation3], 0  ;;  %s444_s0 = inlined_call_operand.vmem [shape: f32[16,4], index: 0, kind: input, shape index: {}]   ;;  %s445_s1 = inlined_call_operand.vmem [shape: f32[4,128], index: 1, kind: input, shape index: {}]   ;;  %s446_s2 = inlined_call_operand.vmem [shape: f32[1,128], index: 2, kind: input, shape index: {}]   ;;  %s447_s3 = inlined_call_operand.hbm [shape: f32[128,128], index: 3, kind: input, shape index: {}]   ;;  %s448_s4 = inlined_call_operand.vmem [shape: f32[1,128], index: 4, kind: input, shape index: {}]   ;;  %s449_s5 = inlined_call_operand.hbm [shape: f32[128,128], index: 5, kind: input, shape index: {}]   ;;  %s450_s6 = inlined_call_operand.vmem [shape: f32[1,128], index: 6, kind: input, shape index: {}]   ;;  %s451_s7 = inlined_call_operand.hbm [shape: f32[16,128], index: 7, kind: output, shape index: {}]  }
   0x1   :  { %13 = vsyncpa [#allocation6], 0 }
   0x2   :  { %14 = vsyncpa [#allocation4], 0  ;;  %s25_s26 = sshll.u32 %s447_s3, 4  ;;  %s361_s27 = smov [#allocation2]   ;;  %s26_s26 = int_to_ptr.hbm [resolvable:$true] %s25_s26 }
   0x3   :  { %s27_s28 = sshll.u32 %s361_s27, 4  ;;  %s40_s8 = sshll.u32 %s449_s5, 4  ;;  %s28_s28 = int_to_ptr.vmem [resolvable:$true] %s27_s28  ;;  %s41_s8 = int_to_ptr.hbm [resolvable:$true] %s40_s8 }
   0x4   :  { %s362_s9 = smov 128   ;;  %s363_s10 = smov 8  }
   0x5   :  { %33 = dma.hbm_to_vmem [thread:$0]  %s26_s26, 2048, %s28_s28, [#allocation3], %s362_s9, %s362_s9, %s363_s10  }
   0x6   :  { %s364_s11 = smov [#allocation5]  }
   0x7   :  { %s42_s12 = sshll.u32 %s364_s11, 4  ;;  %s43_s12 = int_to_ptr.vmem [resolvable:$true] %s42_s12 }
   0x8   :  { %48 = dma.hbm_to_vmem [thread:$0]  %s41_s8, 2048, %s43_s12, [#allocation6], %s362_s9, %s362_s9, %s363_s10  }
   0x9   :  { %355 = dma.done.wait [#allocation3], 2048  }
   0xa   :  { %356 = vsyncadd [#allocation3], 4294965248 }
   0xb   :  { %357 = dma.done.wait [#allocation6], 2048  }
   0xc   :  { %358 = vsyncadd [#allocation6], 4294965248  ;;  %vm73_vm0 = vcmask 1043456   ;;  %vm66_vm1 = vcmask 31744   ;;  %v61_v0 = vld [vmem:[%s445_s1] sm:$0xf] }
   0xd   :  { %v59_v1 = vld [vmem:[%s444_s0] sm:$0xff]  ;;  %232 = vmatpush.msk.msra.mxu0 %vm73_vm0, %v61_v0  ;;  %v117_v2 = vld [vmem:[#allocation2 + $0x78] sm:$0xff]  ;;  %v116_v3 = vld [vmem:[#allocation2 + $0x70] sm:$0xff]  ;;  %s218_s22 = sshll.u32 %s451_s7, 4  ;;  %s219_s22 = int_to_ptr.hbm [resolvable:$true] %s218_s22 }
   0xe   :  { %233 = vmatmul.msk.f32.vlgmr.msra.gmra.mxu0 %vm66_vm1, %v59_v1  ;;  %122 = vmatpush.msra.mxu1 %v117_v2  ;;  %v115_v4 = vld [vmem:[#allocation2 + $0x68] sm:$0xff]  ;;  %v114_v5 = vld [vmem:[#allocation2 + $0x60] sm:$0xff]  ;;  %v113_v7 = vld [vmem:[#allocation2 + $0x58] sm:$0xff] }
   0xf   :  { %235 = vmatpush.msra.mxu3 %v117_v2  ;;  %v60_v6 = vld [vmem:[%s444_s0 + $0x8] sm:$0xff]  ;;  %v112_v8 = vld [vmem:[#allocation2 + $0x50] sm:$0xff]  ;;  %v110_v10 = vld [vmem:[#allocation2 + $0x40] sm:$0xff] }
  0x10   :  { %123 = vmatpush.msra.mxu1 %v116_v3  ;;  %v111_v9 = vld [vmem:[#allocation2 + $0x48] sm:$0xff]  ;;  %v109_v11 = vld [vmem:[#allocation2 + $0x38] sm:$0xff]  ;;  %v108_v12 = vld [vmem:[#allocation2 + $0x30] sm:$0xff] }
  0x11   :  { %236 = vmatpush.msra.mxu3 %v116_v3  ;;  %v107_v13 = vld [vmem:[#allocation2 + $0x28] sm:$0xff]  ;;  %v106_v14 = vld [vmem:[#allocation2 + $0x20] sm:$0xff]  ;;  %v105_v15 = vld [vmem:[#allocation2 + $0x18] sm:$0xff] }
  0x12   :  { %124 = vmatpush.msra.mxu1 %v115_v4  ;;  %v104_v16 = vld [vmem:[#allocation2 + $0x10] sm:$0xff]  ;;  %v103_v17 = vld [vmem:[#allocation2 + $0x8] sm:$0xff]  ;;  %v102_v18 = vld [vmem:[#allocation2] sm:$0xff] }
  0x13   :  { %237 = vmatpush.msra.mxu3 %v115_v4  ;;  %v162_v19 = vld [vmem:[#allocation5 + $0x78] sm:$0xff]  ;;  %v161_v20 = vld [vmem:[#allocation5 + $0x70] sm:$0xff]  ;;  %v160_v21 = vld [vmem:[#allocation5 + $0x68] sm:$0xff] }
  0x14   :  { %125 = vmatpush.msra.mxu1 %v114_v5  ;;  %167 = vmatpush.msrb.mxu0 %v162_v19  ;;  %v159_v22 = vld [vmem:[#allocation5 + $0x60] sm:$0xff]  ;;  %v158_v23 = vld [vmem:[#allocation5 + $0x58] sm:$0xff]  ;;  %v157_v24 = vld [vmem:[#allocation5 + $0x50] sm:$0xff] }
  0x15   :  { %238 = vmatpush.msra.mxu3 %v114_v5  ;;  %251 = vmatpush.msra.mxu2 %v162_v19  ;;  %v156_v25 = vld [vmem:[#allocation5 + $0x48] sm:$0xff]  ;;  %v155_v26 = vld [vmem:[#allocation5 + $0x40] sm:$0xff]  ;;  %v154_v27 = vld [vmem:[#allocation5 + $0x38] sm:$0xff] }
  0x16   :  { %234 = vmatmul.msk.f32.gmra.mxu0 %vm66_vm1, %v60_v6  ;;  %126 = vmatpush.msra.mxu1 %v113_v7  ;;  %v272_v28 = vld [vmem:[%s446_s2] ss:$0 sm:$0xff]  ;;  %v153_v29 = vld [vmem:[#allocation5 + $0x30] sm:$0xff]  ;;  %v152_v30 = vld [vmem:[#allocation5 + $0x28] sm:$0xff] }
  0x17   :  { %239 = vmatpush.msra.mxu3 %v113_v7  ;;  %168 = vmatpush.msrb.mxu0 %v161_v20  ;;  %v151_v33 = vld [vmem:[#allocation5 + $0x20] sm:$0xff]  ;;  %v150_v35 = vld [vmem:[#allocation5 + $0x18] sm:$0xff]  ;;  %v149_v39 = vld [vmem:[#allocation5 + $0x10] sm:$0xff] }
  0x18   :  { %127 = vmatpush.msra.mxu1 %v112_v8  ;;  %252 = vmatpush.msra.mxu2 %v161_v20  ;;  %v148_v40 = vld [vmem:[#allocation5 + $0x8] sm:$0xff]  ;;  %v147_v41 = vld [vmem:[#allocation5] sm:$0xff] }
  0x19   :  { %240 = vmatpush.msra.mxu3 %v112_v8  ;;  %169 = vmatpush.msrb.mxu0 %v160_v21  ;;  %v273_v42 = vld [vmem:[%s448_s4] ss:$0 sm:$0xff]  ;;  %s365_s4 = smov [#allocation7]  }
  0x1a   :  { %128 = vmatpush.msra.mxu1 %v111_v9  ;;  %253 = vmatpush.msra.mxu2 %v160_v21  ;;  %v274_v49 = vld [vmem:[%s450_s6] ss:$0 sm:$0xff]  ;;  %s216_s6 = sshll.u32 %s365_s4, 4  ;;  %s217_s6 = int_to_ptr.vmem [resolvable:$true] %s216_s6 }
  0x1b   :  { %241 = vmatpush.msra.mxu3 %v111_v9  ;;  %170 = vmatpush.msrb.mxu0 %v159_v22 }
  0x1c   :  { %129 = vmatpush.msra.mxu1 %v110_v10  ;;  %254 = vmatpush.msra.mxu2 %v159_v22 }
  0x1d   :  { %242 = vmatpush.msra.mxu3 %v110_v10  ;;  %171 = vmatpush.msrb.mxu0 %v158_v23 }
  0x1e   :  { %130 = vmatpush.msra.mxu1 %v109_v11  ;;  %255 = vmatpush.msra.mxu2 %v158_v23 }
  0x1f   :  { %243 = vmatpush.msra.mxu3 %v109_v11  ;;  %172 = vmatpush.msrb.mxu0 %v157_v24 }
  0x20   :  { %131 = vmatpush.msra.mxu1 %v108_v12  ;;  %256 = vmatpush.msra.mxu2 %v157_v24 }
  0x21   :  { %244 = vmatpush.msra.mxu3 %v108_v12  ;;  %173 = vmatpush.msrb.mxu0 %v156_v25 }
  0x22   :  { %132 = vmatpush.msra.mxu1 %v107_v13  ;;  %257 = vmatpush.msra.mxu2 %v156_v25 }
  0x23   :  { %245 = vmatpush.msra.mxu3 %v107_v13  ;;  %174 = vmatpush.msrb.mxu0 %v155_v26 }
  0x24   :  { %133 = vmatpush.msra.mxu1 %v106_v14  ;;  %258 = vmatpush.msra.mxu2 %v155_v26 }
  0x25   :  { %246 = vmatpush.msra.mxu3 %v106_v14  ;;  %175 = vmatpush.msrb.mxu0 %v154_v27 }
  0x26   :  { %134 = vmatpush.msra.mxu1 %v105_v15  ;;  %259 = vmatpush.msra.mxu2 %v154_v27 }
  0x27   :  { %247 = vmatpush.msra.mxu3 %v105_v15  ;;  %176 = vmatpush.msrb.mxu0 %v153_v29 }
  0x28   :  { %135 = vmatpush.msra.mxu1 %v104_v16  ;;  %260 = vmatpush.msra.mxu2 %v153_v29 }
  0x29   :  { %248 = vmatpush.msra.mxu3 %v104_v16  ;;  %177 = vmatpush.msrb.mxu0 %v152_v30 }
  0x2a   :  { %136 = vmatpush.msra.mxu1 %v103_v17  ;;  %261 = vmatpush.msra.mxu2 %v152_v30 }
  0x2b   :  { %249 = vmatpush.msra.mxu3 %v103_v17  ;;  %178 = vmatpush.msrb.mxu0 %v151_v33 }
  0x2c   :  { %137 = vmatpush.msra.mxu1 %v102_v18  ;;  %262 = vmatpush.msra.mxu2 %v151_v33 }
  0x2d   :  { %250 = vmatpush.msra.mxu3 %v102_v18  ;;  %179 = vmatpush.msrb.mxu0 %v150_v35 }
  0x2e   :  { %263 = vmatpush.msra.mxu2 %v150_v35 }
  0x2f   :  { %180 = vmatpush.msrb.mxu0 %v149_v39 }
  0x30   :  { %264 = vmatpush.msra.mxu2 %v149_v39 }
  0x31   :  { %181 = vmatpush.msrb.mxu0 %v148_v40 }
  0x32   :  { %265 = vmatpush.msra.mxu2 %v148_v40 }
  0x33   :  { %182 = vmatpush.msrb.mxu0 %v147_v41 }
  0x34   :  { %266 = vmatpush.msra.mxu2 %v147_v41 }
  0x8b   :  { %v94_v31 = vpop.f32.mrf.mxu0 }
  0x8c   :  { %v95_v32 = vadd.f32 %v272_v28, %v94_v31 }
  0x8e   :  { %v100_v34 = vmax.f32 %v95_v32, 0.0 }
  0x90   :  { %138 = vmatmul.f32.vlgmr.msra.gmra.mxu1 %v100_v34 }
  0x93   :  { %v97_v36 = vpop.f32.mrf.mxu0 }
  0x94   :  { %v98_v37 = vadd.f32 %v272_v28, %v97_v36 }
  0x96   :  { %v101_v38 = vmax.f32 %v98_v37, 0.0 }
  0x98   :  { %141 = vmatmul.f32.vlgmr.msra.gmra.mxu3 %v101_v38 }
 0x10d   :  { %v139_v43 = vpop.f32.mrf.mxu1 }
 0x10e   :  { %v140_v44 = vadd.f32 %v273_v42, %v139_v43 }
 0x110   :  { %v145_v45 = vmax.f32 %v140_v44, 0.0 }
 0x112   :  { %183 = vmatmul.f32.vlgmr.msrb.gmra.mxu0 %v145_v45 }
 0x11b   :  { %v142_v46 = vpop.f32.mrf.mxu3 }
 0x11c   :  { %v143_v47 = vadd.f32 %v273_v42, %v142_v46 }
 0x11e   :  { %v146_v48 = vmax.f32 %v143_v47, 0.0 }
 0x120   :  { %186 = vmatmul.f32.vlgmr.msra.gmra.mxu2 %v146_v48 }
 0x18f   :  { %v184_v50 = vpop.f32.mrf.mxu0 }
 0x190   :  { %v185_v51 = vadd.f32 %v274_v49, %v184_v50 }
 0x192   :  { %190 = vmax.xlane.f32.xlu0 %v185_v51 }
 0x1a3   :  { %v187_v52 = vpop.f32.mrf.mxu2 }
 0x1a4   :  { %v188_v53 = vadd.f32 %v274_v49, %v187_v52 }
 0x1a6   :  { %192 = vmax.xlane.f32.xlu0 %v188_v53 }
 0x205   :  { %v191_v54 = vpop.xlane.xlu0 %190 }
 0x206   :  { %v194_v55 = vsub.f32 %v185_v51, %v191_v54 }
 0x208   :  { %v196_v56 = vmul.f32 1.442695, %v194_v55 }
 0x20a   :  { %275 = vpow2.f32 %v196_v56 }
 0x210   :  { %v276_v57 = vpop.eup %275 }
 0x211   :  { %200 = vadd.xlane.f32.xlu1 %v276_v57 }
 0x219   :  { %v193_v58 = vpop.xlane.xlu0 %192 }
 0x21a   :  { %v195_v59 = vsub.f32 %v188_v53, %v193_v58 }
 0x21c   :  { %v198_v60 = vmul.f32 1.442695, %v195_v59 }
 0x21e   :  { %277 = vpow2.f32 %v198_v60 }
 0x224   :  { %v278_v61 = vpop.eup %277 }
 0x225   :  { %202 = vadd.xlane.f32.xlu1 %v278_v61 }
 0x284   :  { %v201_v62 = vpop.xlane.xlu1 %200 }
 0x285   :  { %279 = vlog2.f32 %v201_v62 }
 0x28b   :  { %v280_v63 = vpop.eup %279 }
 0x28c   :  { %v205_v0 = vmul.f32 0.6931472, %v280_v63 }
 0x28e   :  { %v208_v1 = vsub.f32 %v194_v55, %v205_v0 }
 0x290   :  { %210 = vst [vmem:[#allocation7] sm:$0xff] %v208_v1 }
 0x298   :  { %v203_v2 = vpop.xlane.xlu1 %202 }
 0x299   :  { %281 = vlog2.f32 %v203_v2 }
 0x29f   :  { %v282_v3 = vpop.eup %281 }
 0x2a0   :  { %v207_v4 = vmul.f32 0.6931472, %v282_v3 }
 0x2a2   :  { %v209_v5 = vsub.f32 %v195_v59, %v207_v4 }
 0x2a4   :  { %211 = vst [vmem:[#allocation7 + $0x8] sm:$0xff] %v209_v5 }
 0x2a5   :  { %224 = dma.vmem_to_hbm [thread:$0]  %s217_s6, 256, %s219_s22, [#allocation4], %s362_s9, %s362_s9, %s363_s10  }
 0x2a6   :  { %359 = dma.done.wait [#allocation4], 256  }
 0x2a7   :  { %360 = vsyncadd [#allocation4], 4294967040 }
 0x2a8   :  { %229 = vsyncpa [#allocation3], 1 }
 0x2a9   :  { %230 = vsyncpa [#allocation6], 1 }
 0x2aa   :  { %231 = vsyncpa [#allocation4], 1 }

</bundles_post_ra>
